<compile_context>
chip_gen: v5e
topology: v5e:2x2
jax: 0.10.0
libtpu: 0.0.40
codegen_flags: <defaults>
</compile_context>

<pallas_src>
import functools

import jax
import jax.numpy as jnp
from jax.experimental import pallas as pl
from jax.experimental.pallas import tpu as pltpu

HID = 256      # classifier hidden width (fixed by the module)
L_PAD = 128    # lane-dense padded logit width (>= num_labels, multiple of 128)


def _round_up(n, m):
    return ((n + m - 1) // m) * m


def _mlp_kernel(x_ref, w1_ref, b1_ref, w2_ref, b2_ref, o_ref):
    # x: (TB, H) caller dtype, w1: (H, 256) bf16, b1: (1, 256) f32,
    # w2: (256, L_PAD) bf16, b2: (1, L_PAD) f32, o: (TB, L_PAD) bf16.
    # Cast x -> bf16 here (instead of a standalone XLA cast in the wrapper):
    # the cast sits on the otherwise idle VPU slot and saves a full HBM pass.
    x = x_ref[...].astype(jnp.bfloat16)
    # Linear 1 on the MXU (bf16 in, f32 accumulate), bias + ReLU on the VPU.
    h = jnp.dot(x, w1_ref[...], preferred_element_type=jnp.float32)
    h = jnp.maximum(h + b1_ref[...], 0.0)
    # Dropout(0.3): identity in eval mode.
    # TODO(synk): training-mode dropout would need pltpu.prng_seed /
    #             pltpu.prng_random_bits with mask * 1/(1-p) scaling.
    h = h.astype(jnp.bfloat16)
    # Linear 2 (padded to 128 output lanes -> unmasked lane-dense stores).
    out = jnp.dot(h, w2_ref[...], preferred_element_type=jnp.float32) + b2_ref[...]
    o_ref[...] = out.astype(o_ref.dtype)


def prepare_classifier_params(w1, b1, w2, b2):
    """One-time prep from torch layout (W: (out, in)) to kernel layout.

    Returns (w1_t, b1_r, w2_pad, b2_pad, num_labels); do this at param-load
    time so no transpose/pad is materialized in HBM on every forward call.
    """
    L = w2.shape[0]
    w1_t = jnp.asarray(w1, jnp.float32).T.astype(jnp.bfloat16)           # (H, 256)
    b1_r = jnp.asarray(b1, jnp.float32).reshape(1, HID)                  # (1, 256) f32
    w2_t = jnp.asarray(w2, jnp.float32).T                                # (256, L)
    w2_pad = (
        jnp.zeros((HID, L_PAD), jnp.float32).at[:, :L].set(w2_t).astype(jnp.bfloat16)
    )                                                                    # (256, 128)
    b2_pad = jnp.zeros((1, L_PAD), jnp.float32).at[0, :L].set(
        jnp.asarray(b2, jnp.float32)
    )                                                                    # (1, 128) f32
    return w1_t, b1_r, w2_pad, b2_pad, L


def _choose_tile_and_vmem(B, H, x_itemsize):
    """Pick the batch tile TB and an explicit scoped-VMEM limit.

    Budget: double-buffered x tile + double-buffered bf16 output tile +
    (double-buffered) weight blocks must fit ~26 MiB, which is portable across
    v5e (16 MiB default scoped -> raised explicitly here), v6e (32 MiB) and
    v7x (32 MiB default / 64 MiB physical per TensorCore).  Small H gets large
    tiles so each grid step moves ~1 MiB+ of x (amortizes ~0.35 us/step
    pipeline overhead); when B allows it we force >= 2 grid steps so both v7x
    TensorCores are active on the "parallel" batch axis.
    """
    out_itemsize = 2  # bf16 logits
    # VMEM held by the (default double-buffered) weight / bias blocks.
    # TODO(synk): pipeline_mode=pl.Buffered(1) on the constant-index weight
    #             specs would reclaim half of this at very large H.
    w_bytes = 2 * (H * HID * 2 + HID * L_PAD * 2 + HID * 4 + L_PAD * 4)
    per_row = 2 * (H * x_itemsize + L_PAD * out_itemsize)  # x + out, double-buffered
    budget = 26 << 20
    tb_vmem = max(8, ((budget - w_bytes) // per_row) // 8 * 8)

    if B < 8:
        tb = B                                  # block == full batch dim (allowed)
    elif B < 16:
        tb = min(tb_vmem, _round_up(B, 8))      # single tile
    else:
        # >= 2 grid steps (v7x megacore), capped by the VMEM-derived max and a
        # sanity bound (4096 rows is already >> the per-step overhead knee).
        tb = min(tb_vmem, 4096, _round_up(pl.cdiv(B, 2), 8))
    tb = max(tb, 1)

    total = w_bytes + tb * per_row
    vmem_limit = int(min(max(total + (2 << 20), 16 << 20), 32 << 20))
    return tb, vmem_limit


@functools.partial(jax.jit, static_argnames=("num_labels",))
def custom_classifier_forward(x, w1_t, b1_r, w2_pad, b2_pad, num_labels):
    """x: (B, H) any float dtype; params from prepare_classifier_params."""
    B, H = x.shape
    TB, vmem_limit = _choose_tile_and_vmem(B, H, x.dtype.itemsize)

    out = pl.pallas_call(
        _mlp_kernel,
        out_shape=jax.ShapeDtypeStruct((B, L_PAD), jnp.bfloat16),
        grid_spec=pltpu.PrefetchScalarGridSpec(
            num_scalar_prefetch=0,
            # cdiv grid: Pallas masks the partial last block itself -> no
            # wrapper-side jnp.pad and no wasted DMA/writeback on garbage rows.
            grid=(pl.cdiv(B, TB),),
            in_specs=[
                # x: tiled over the batch axis (pipelined HBM->VMEM DMA),
                # passed in its original dtype (cast happens in-kernel).
                pl.BlockSpec((TB, H), lambda i: (i, 0)),
                # Weights / biases: constant index_map -> fetched once,
                # VMEM-resident across all grid steps.
                pl.BlockSpec((H, HID), lambda i: (0, 0)),
                pl.BlockSpec((1, HID), lambda i: (0, 0)),
                pl.BlockSpec((HID, L_PAD), lambda i: (0, 0)),
                pl.BlockSpec((1, L_PAD), lambda i: (0, 0)),
            ],
            out_specs=pl.BlockSpec((TB, L_PAD), lambda i: (i, 0)),
        ),
        compiler_params=pltpu.CompilerParams(
            # Batch tiles are independent -> shard across v7x's 2 TensorCores;
            # neutral on single-core v5e/v6e.
            dimension_semantics=("parallel",),
            vmem_limit_bytes=vmem_limit,
        ),
    )(x, w1_t, b1_r, w2_pad, b2_pad)

    # Rows already match B (cdiv grid); only strip the lane padding.
    return out[:, :num_labels]


def _init_params(key, hidden_size, num_labels):
    k1, k2, k3, k4 = jax.random.split(key, 4)
    # Mimic nn.Linear's uniform(-1/sqrt(fan_in), 1/sqrt(fan_in)) init.
    bound1 = 1.0 / jnp.sqrt(hidden_size)
    bound2 = 1.0 / jnp.sqrt(256.0)
    w1 = jax.random.uniform(k1, (256, hidden_size), jnp.float32, -bound1, bound1)
    b1 = jax.random.uniform(k2, (256,), jnp.float32, -bound1, bound1)
    w2 = jax.random.uniform(k3, (num_labels, 256), jnp.float32, -bound2, bound2)
    b2 = jax.random.uniform(k4, (num_labels,), jnp.float32, -bound2, bound2)
    return w1, b1, w2, b2


def _reference(x, w1, b1, w2, b2):
    # Eval-mode dropout == identity.
    return jnp.maximum(x @ w1.T + b1, 0.0) @ w2.T + b2


if __name__ == "__main__":
    key = jax.random.PRNGKey(0)
    k_x, k_x2, k_p = jax.random.split(key, 3)

    hidden_size, num_labels = 32, 2
    w1, b1, w2, b2 = _init_params(k_p, hidden_size, num_labels)
    w1_t, b1_r, w2_pad, b2_pad, L = prepare_classifier_params(w1, b1, w2, b2)

    # Small batch (single tile, grid=(1,)).
    x_small = jax.random.normal(k_x, (8, hidden_size), jnp.float32)
    out_small = jax.block_until_ready(
        custom_classifier_forward(x_small, w1_t, b1_r, w2_pad, b2_pad, L)
    )
    ref_small = _reference(x_small, w1, b1, w2, b2)
    assert out_small.shape == (8, num_labels)
    # bf16 MXU inputs / bf16 logits -> relaxed tolerance vs. the f32 reference.
    assert jnp.allclose(out_small.astype(jnp.float32), ref_small, atol=3e-2, rtol=3e-2)

    # Larger batch: 2 parallel grid steps with a partial last block (no pad).
    x_big = jax.random.normal(k_x2, (600, hidden_size), jnp.float32)
    out_big = jax.block_until_ready(
        custom_classifier_forward(x_big, w1_t, b1_r, w2_pad, b2_pad, L)
    )
    ref_big = _reference(x_big, w1, b1, w2, b2)
    assert out_big.shape == (600, num_labels)
    assert jnp.allclose(out_big.astype(jnp.float32), ref_big, atol=3e-2, rtol=3e-2)

    print("KERNEL_OK")
</pallas_src>

<mosaic_0001>
module attributes {stable_mosaic.version = 11 : i64} {
  func.func @_mlp_kernel(%arg0: i32, %arg1: memref<8x32xf32, #tpu.memory_space<vmem>>, %arg2: memref<32x256xbf16, #tpu.memory_space<vmem>>, %arg3: memref<1x256xf32, #tpu.memory_space<vmem>>, %arg4: memref<256x128xbf16, #tpu.memory_space<vmem>>, %arg5: memref<1x128xf32, #tpu.memory_space<vmem>>, %arg6: memref<8x128xbf16, #tpu.memory_space<vmem>>) attributes {dimension_semantics = [#tpu.dimension_semantics<parallel>], iteration_bounds = array<i64: 1>, scalar_prefetch = 0 : i64, scratch_operands = 0 : i64, tpu.core_type = #tpu.core_type<tc>, window_params = [{transform_indices = @transform_0, window_bounds = array<i64: 8, 32>}, {pipeline_mode = #tpu.pipeline_mode<synchronous>, transform_indices = @transform_1, window_bounds = array<i64: 32, 256>}, {pipeline_mode = #tpu.pipeline_mode<synchronous>, transform_indices = @transform_2, window_bounds = array<i64: 1, 256>}, {pipeline_mode = #tpu.pipeline_mode<synchronous>, transform_indices = @transform_3, window_bounds = array<i64: 256, 128>}, {pipeline_mode = #tpu.pipeline_mode<synchronous>, transform_indices = @transform_4, window_bounds = array<i64: 1, 128>}, {transform_indices = @transform_5, window_bounds = array<i64: 8, 128>}]} {
    %c0 = arith.constant 0 : index
    %c0_0 = arith.constant 0 : index
    %0 = vector.load %arg1[%c0, %c0_0] : memref<8x32xf32, #tpu.memory_space<vmem>>, vector<8x32xf32>
    %1 = arith.truncf %0 : vector<8x32xf32> to vector<8x32xbf16>
    %c0_1 = arith.constant 0 : index
    %c0_2 = arith.constant 0 : index
    %2 = vector.load %arg2[%c0_1, %c0_2] : memref<32x256xbf16, #tpu.memory_space<vmem>>, vector<32x256xbf16>
    %cst = arith.constant dense<0.000000e+00> : vector<8x256xf32>
    %3 = tpu.matmul %1, %2, %cst {dimension_numbers = #tpu.dot_dimension_numbers<[1], [0], [0], [1], [0, 0, 1, 1], [], []>} : vector<8x32xbf16>, vector<32x256xbf16>, vector<8x256xf32> -> vector<8x256xf32>
    %c0_3 = arith.constant 0 : index
    %c0_4 = arith.constant 0 : index
    %4 = vector.load %arg3[%c0_3, %c0_4] : memref<1x256xf32, #tpu.memory_space<vmem>>, vector<1x256xf32>
    %5 = vector.broadcast %4 : vector<1x256xf32> to vector<8x256xf32>
    %6 = arith.addf %3, %5 : vector<8x256xf32>
    %cst_5 = arith.constant 0.000000e+00 : f32
    %7 = vector.broadcast %cst_5 : f32 to vector<8x256xf32>
    %8 = arith.maximumf %6, %7 : vector<8x256xf32>
    %9 = arith.truncf %8 : vector<8x256xf32> to vector<8x256xbf16>
    %c0_6 = arith.constant 0 : index
    %c0_7 = arith.constant 0 : index
    %10 = vector.load %arg4[%c0_6, %c0_7] : memref<256x128xbf16, #tpu.memory_space<vmem>>, vector<256x128xbf16>
    %cst_8 = arith.constant dense<0.000000e+00> : vector<8x128xf32>
    %11 = tpu.matmul %9, %10, %cst_8 {dimension_numbers = #tpu.dot_dimension_numbers<[1], [0], [0], [1], [0, 0, 1, 1], [], []>} : vector<8x256xbf16>, vector<256x128xbf16>, vector<8x128xf32> -> vector<8x128xf32>
    %c0_9 = arith.constant 0 : index
    %c0_10 = arith.constant 0 : index
    %12 = vector.load %arg5[%c0_9, %c0_10] : memref<1x128xf32, #tpu.memory_space<vmem>>, vector<1x128xf32>
    %13 = vector.broadcast %12 : vector<1x128xf32> to vector<8x128xf32>
    %14 = arith.addf %11, %13 : vector<8x128xf32>
    %15 = arith.truncf %14 : vector<8x128xf32> to vector<8x128xbf16>
    %c0_11 = arith.constant 0 : index
    %c0_12 = arith.constant 0 : index
    %16 = vector.load %arg6[%c0_11, %c0_12] : memref<8x128xbf16, #tpu.memory_space<vmem>>, vector<8x128xbf16>
    tpu.vector_store %arg6[%c0_11, %c0_12], %15 {strides = array<i32>} : memref<8x128xbf16, #tpu.memory_space<vmem>>, vector<8x128xbf16>,
    return
  }
  func.func @transform_0(%arg0: i32) -> (i32, i32) {
    %c0_i32 = arith.constant 0 : i32
    %c0_i32_0 = arith.constant 0 : i32
    return %arg0, %c0_i32 : i32, i32
  }
  func.func @transform_1(%arg0: i32) -> (i32, i32) {
    %c0_i32 = arith.constant 0 : i32
    %c0_i32_0 = arith.constant 0 : i32
    %c0_i32_1 = arith.constant 0 : i32
    return %c0_i32, %c0_i32_0 : i32, i32
  }
  func.func @transform_2(%arg0: i32) -> (i32, i32) {
    %c0_i32 = arith.constant 0 : i32
    %c0_i32_0 = arith.constant 0 : i32
    %c0_i32_1 = arith.constant 0 : i32
    return %c0_i32, %c0_i32_0 : i32, i32
  }
  func.func @transform_3(%arg0: i32) -> (i32, i32) {
    %c0_i32 = arith.constant 0 : i32
    %c0_i32_0 = arith.constant 0 : i32
    %c0_i32_1 = arith.constant 0 : i32
    return %c0_i32, %c0_i32_0 : i32, i32
  }
  func.func @transform_4(%arg0: i32) -> (i32, i32) {
    %c0_i32 = arith.constant 0 : i32
    %c0_i32_0 = arith.constant 0 : i32
    %c0_i32_1 = arith.constant 0 : i32
    return %c0_i32, %c0_i32_0 : i32, i32
  }
  func.func @transform_5(%arg0: i32) -> (i32, i32) {
    %c0_i32 = arith.constant 0 : i32
    %c0_i32_0 = arith.constant 0 : i32
    return %arg0, %c0_i32 : i32, i32
  }
}

</mosaic_0001>

<bundles_post_ra>
// kernel: custom_classifier_forward.1
= control target key start
LH: loop header
LB: loop body
LE: loop exit
PB: predicated region body
PF: predicated region fallthrough
CT: control target
= control target key end

     0   :  { %10 = vsyncpa [#allocation3], 0  ;;  %s582_s0 = inlined_call_operand.hbm [shape: f32[8,32], index: 0, kind: input, shape index: {}]   ;;  %s583_s1 = inlined_call_operand.hbm [shape: bf16[32,256], index: 1, kind: input, shape index: {}]   ;;  %s584_s2 = inlined_call_operand.hbm [shape: f32[1,256], index: 2, kind: input, shape index: {}]   ;;  %s585_s3 = inlined_call_operand.hbm [shape: bf16[256,128], index: 3, kind: input, shape index: {}]   ;;  %s586_s4 = inlined_call_operand.vmem [shape: f32[1,128], index: 4, kind: input, shape index: {}]   ;;  %s587_s5 = inlined_call_operand.vmem [shape: bf16[8,128], index: 5, kind: output, shape index: {}]  }
   0x1   :  { %11 = vsyncpa [#allocation5], 0  ;;  %s28_s20 = sshll.u32 %s583_s1, 4  ;;  %s29_s20 = int_to_ptr.hbm [resolvable:$true] %s28_s20 }
   0x2   :  { %12 = vsyncpa [#allocation8], 0  ;;  %s526_s21 = smov [#allocation4]   ;;  %s18_s25 = sshll.u32 %s582_s0, 4  ;;  %s19_s25 = int_to_ptr.hbm [resolvable:$true] %s18_s25 }
   0x3   :  { %s30_s22 = sshll.u32 %s526_s21, 4  ;;  %s527_s26 = smov 128   ;;  %s31_s22 = int_to_ptr.vmem [resolvable:$true] %s30_s22 }
   0x4   :  { %s528_s27 = smov 8   ;;  %s529_s28 = smov [#allocation2]  }
   0x5   :  { %36 = dma.hbm_to_vmem [thread:$0]  %s29_s20, 512, %s31_s22, [#allocation5], %s527_s26, %s527_s26, %s528_s27  }
   0x6   :  { %s20_s29 = sshll.u32 %s529_s28, 4  ;;  %s42_s7 = sshll.u32 %s584_s2, 4  ;;  %s21_s29 = int_to_ptr.vmem [resolvable:$true] %s20_s29  ;;  %s43_s7 = int_to_ptr.hbm [resolvable:$true] %s42_s7 }
   0x7   :  { %23 = dma.hbm_to_vmem [thread:$0]  %s19_s25, 128, %s21_s29, [#allocation3]  }
   0x8   :  { %s52_s9 = sshll.u32 %s585_s3, 4  ;;  %s530_s10 = smov [#allocation6]   ;;  %s53_s9 = int_to_ptr.hbm [resolvable:$true] %s52_s9 }
   0x9   :  { %s44_s11 = sshll.u32 %s530_s10, 4  ;;  %s531_s0 = smov [#allocation7]   ;;  %s45_s11 = int_to_ptr.vmem [resolvable:$true] %s44_s11 }
   0xa   :  { %47 = dma.hbm_to_vmem [thread:$0]  %s43_s7, 32, %s45_s11, [#allocation5]  }
   0xb   :  { %s54_s12 = sshll.u32 %s531_s0, 4  ;;  %s532_s13 = smov 64   ;;  %s55_s12 = int_to_ptr.vmem [resolvable:$true] %s54_s12 }
   0xc   :  { %s533_s14 = smov 4  }
   0xd   :  { %60 = dma.hbm_to_vmem [thread:$0]  %s53_s9, 2048, %s55_s12, [#allocation8], %s532_s13, %s532_s13, %s533_s14  }
   0xe   :  { %520 = dma.done.wait [#allocation3], 128  }
   0xf   :  { %521 = vsyncadd [#allocation3], 4294967168 }
  0x10   :  { %522 = dma.done.wait [#allocation5], 544  }
  0x11   :  { %523 = vsyncadd [#allocation5], 4294966752 }
  0x12   :  { %524 = dma.done.wait [#allocation8], 2048  }
  0x13   :  { %525 = vsyncadd [#allocation8], 4294965248  ;;  %v323_v0 = vld [vmem:[#allocation4 + $0x10] sm:$0xf]  ;;  %v398_v1 = vld [vmem:[#allocation4 + $0x14] sm:$0xf0] }
  0x14   :  { %v397_v2 = vld [vmem:[#allocation4 + $0x14] sm:$0xf]  ;;  %v324_v3 = vor.u32 %v398_v1, %v323_v0  ;;  %v325_v4 = vld [vmem:[#allocation4 + $0x18] sm:$0xf0]  ;;  %v315_v5 = vld [vmem:[#allocation4] sm:$0xf] }
  0x15   :  { %v396_v6 = vld [vmem:[#allocation4 + $0x4] sm:$0xf0]  ;;  %v328_v7 = vor.u32 %v397_v2, %v325_v4  ;;  %v395_v8 = vld [vmem:[#allocation4 + $0x4] sm:$0xf]  ;;  %v317_v9 = vld [vmem:[#allocation4 + $0x8] sm:$0xf0] }
  0x16   :  { %122 = vmatpush.bf16.msra.mxu0 %v324_v3  ;;  %v316_v10 = vor.u32 %v396_v6, %v315_v5  ;;  %v80_v11 = vld [vmem:[#allocation2] sm:$0xff]  ;;  %v320_v14 = vor.u32 %v395_v8, %v317_v9  ;;  %vm112_vm0 = vcmask 261120   ;;  %v404_v18 = vld [vmem:[#allocation7 + $0x28] sm:$0xff]  ;;  %v403_v20 = vld [vmem:[#allocation7 + $0x20] sm:$0xff] }
  0x17   :  { %v406_v12 = vld [vmem:[#allocation7 + $0x38] sm:$0xff]  ;;  %135 = vmatpush.bf16.msra.mxu1 %v328_v7  ;;  %v405_v15 = vld [vmem:[#allocation7 + $0x30] sm:$0xff]  ;;  %v81_v17 = vpack.c.bf16 %v80_v11, %v80_v11  ;;  %v412_v19 = vld [vmem:[#allocation7 + $0x68] sm:$0xff] }
  0x18   :  { %v414_v13 = vld [vmem:[#allocation7 + $0x78] sm:$0xff]  ;;  %278 = vmatpush.bf16.msra.mxu2 %v406_v12  ;;  %v413_v16 = vld [vmem:[#allocation7 + $0x70] sm:$0xff]  ;;  %v411_v21 = vld [vmem:[#allocation7 + $0x60] sm:$0xff] }
  0x19   :  { %291 = vmatpush.bf16.msra.mxu3 %v414_v13  ;;  %v402_v22 = vld [vmem:[#allocation7 + $0x18] sm:$0xff]  ;;  %v401_v24 = vld [vmem:[#allocation7 + $0x10] sm:$0xff]  ;;  %v400_v26 = vld [vmem:[#allocation7 + $0x8] sm:$0xff] }
  0x1a   :  { %123 = vmatpush.bf16.msra.mxu0 %v316_v10  ;;  %v410_v23 = vld [vmem:[#allocation7 + $0x58] sm:$0xff]  ;;  %v409_v25 = vld [vmem:[#allocation7 + $0x50] sm:$0xff]  ;;  %v408_v27 = vld [vmem:[#allocation7 + $0x48] sm:$0xff] }
  0x1b   :  { %136 = vmatpush.bf16.msra.mxu1 %v320_v14  ;;  %v399_v28 = vld [vmem:[#allocation7] sm:$0xff]  ;;  %v86_v30 = vld [vmem:[#allocation6] sm:$0x3]  ;;  %v423_v43 = vld [vmem:[%s586_s4] ss:$0 sm:$0xff] }
  0x1c   :  { %279 = vmatpush.bf16.msra.mxu2 %v405_v15  ;;  %v407_v29 = vld [vmem:[#allocation7 + $0x40] sm:$0xff]  ;;  %v88_v31 = vperm.slane %v86_v30, 0  ;;  %v89_v32 = vperm.slane %v86_v30, 1 }
  0x1d   :  { %292 = vmatpush.bf16.msra.mxu3 %v413_v16  ;;  %329 = vmatmul.msk.bf16.vlgmr.msra.gmra.mxu0 %vm112_vm0, %v81_v17 }
  0x1e   :  { %330 = vmatmul.msk.bf16.vlgmr.msra.gmra.mxu1 %vm112_vm0, %v81_v17 }
  0x20   :  { %280 = vmatpush.bf16.msra.mxu2 %v404_v18 }
  0x21   :  { %293 = vmatpush.bf16.msra.mxu3 %v412_v19 }
  0x24   :  { %281 = vmatpush.bf16.msra.mxu2 %v403_v20 }
  0x25   :  { %294 = vmatpush.bf16.msra.mxu3 %v411_v21 }
  0x28   :  { %282 = vmatpush.bf16.msra.mxu2 %v402_v22 }
  0x29   :  { %295 = vmatpush.bf16.msra.mxu3 %v410_v23 }
  0x2c   :  { %283 = vmatpush.bf16.msra.mxu2 %v401_v24 }
  0x2d   :  { %296 = vmatpush.bf16.msra.mxu3 %v409_v25 }
  0x30   :  { %284 = vmatpush.bf16.msra.mxu2 %v400_v26 }
  0x31   :  { %297 = vmatpush.bf16.msra.mxu3 %v408_v27 }
  0x34   :  { %285 = vmatpush.bf16.msra.mxu2 %v399_v28 }
  0x35   :  { %298 = vmatpush.bf16.msra.mxu3 %v407_v29 }
  0x9a   :  { %v125_v33 = vpop.f32.mrf.mxu0 }
  0x9b   :  { %v126_v34 = vadd.f32 %v125_v33, %v88_v31  ;;  %v138_v35 = vpop.f32.mrf.mxu1 }
  0x9c   :  { %v139_v36 = vadd.f32 %v138_v35, %v89_v32 }
  0x9d   :  { %v142_v37 = vmax.f32 %v126_v34, 0.0 }
  0x9e   :  { %v143_v38 = vmax.f32 %v139_v36, 0.0 }
  0x9f   :  { %v144_v39 = vpack.c.bf16 %v142_v37, %v142_v37 }
  0xa0   :  { %v145_v40 = vpack.c.bf16 %v143_v38, %v143_v38 }
  0xa1   :  { %286 = vmatmul.bf16.vlgmr.msra.gmra.mxu2 %v144_v39 }
  0xa2   :  { %299 = vmatmul.bf16.vlgmr.msra.gmra.mxu3 %v145_v40  ;;  %v127_v41 = vpop.f32.mrf.mxu0 }
  0xa3   :  { %v140_v42 = vpop.f32.mrf.mxu1 }
 0x124   :  { %v287_v44 = vpop.f32.mrf.mxu2 }
 0x125   :  { %v288_v45 = vadd.f32 %v423_v43, %v287_v44  ;;  %v300_v46 = vpop.f32.mrf.mxu3 }
 0x127   :  { %v301_v47 = vadd.f32 %v300_v46, %v288_v45 }
 0x129   :  { %v304_v48 = vpack.c.bf16 %v301_v47, %v301_v47 }
 0x12b   :  { %305 = vst [vmem:[%s587_s5] sm:$0xf] %v304_v48 }
 0x12c   :  { %v289_v49 = vpop.f32.mrf.mxu2 }
 0x12d   :  { %v302_v50 = vpop.f32.mrf.mxu3 }
 0x12e   :  { %310 = vsyncpa [#allocation3], 1 }
 0x12f   :  { %311 = vsyncpa [#allocation5], 1 }
 0x130   :  { %312 = vsyncpa [#allocation8], 1 }

</bundles_post_ra>
